<compile_context>
chip_gen: v7x
topology: tpu7x:2x2x1
jax: 0.10.0
libtpu: 0.0.40
codegen_flags: <defaults>
</compile_context>

<pallas_src>
import functools

import jax
import jax.numpy as jnp
import numpy as np
from jax.experimental import pallas as pl
from jax.experimental.pallas import tpu as pltpu

_EPS = 1e-9
_MAX_EDGE_TILE = 32768           # edges (lanes) per grid step; sweep 16384-65536.
_VMEM_BUDGET = 20 * 1024 * 1024  # budget for double-buffered inputs + scratch.


@functools.lru_cache(maxsize=1)
def _tensorcores_per_chip() -> int:
    """v7x-class chips expose two TensorCores per chip; v5e/v6e have one."""
    try:
        kind = jax.devices()[0].device_kind.lower()
    except Exception:
        return 1
    return 2 if "v7" in kind else 1


def _uhg_edge_kernel(a_ref, b_ref, out_ref, acc_q_ref, acc_n_ref,
                     *, num_pos, num_neg):
    """Per-edge UHG quadrance + region-masked reductions.

    Blocks: a_ref/b_ref (D, T) endpoints.  Scratch: two (1, T) lane-wide
    accumulators.  Output: one (1, 1, 128) row per leading grid slice,
    lanes: [sum_pos_region_quad, sum_neg_region_relu].
    """
    step = pl.program_id(1)
    n_steps = pl.num_programs(1)

    @pl.when(step == 0)
    def _init():
        acc_q_ref[...] = jnp.zeros_like(acc_q_ref)
        acc_n_ref[...] = jnp.zeros_like(acc_n_ref)

    a = a_ref[...]                      # (D, T) float32
    b = b_ref[...]                      # (D, T) float32
    d, tile = a.shape
    a_last = a[d - 1:d, :]              # (1, T)
    b_last = b[d - 1:d, :]

    # UHG inner product / norms: full sublane sum minus 2x the last-feature
    # term (cheaper than multiplying by a +/-1 sign vector every step).
    dot = jnp.sum(a * b, axis=0, keepdims=True) - 2.0 * a_last * b_last
    na = jnp.sum(a * a, axis=0, keepdims=True) - 2.0 * a_last * a_last
    nb = jnp.sum(b * b, axis=0, keepdims=True) - 2.0 * b_last * b_last

    denom = jnp.maximum(jnp.abs(na * nb), _EPS)
    # Approx reciprocal routes to the otherwise-idle EUP slot.
    quad = 1.0 - (dot * dot) * pl.reciprocal(denom, approx=True)   # (1, T)

    # Pos/neg region masks from the block's static global edge offset — no
    # weight DMA.  Regions are [0, num_pos) and [num_pos, num_pos + num_neg);
    # pad columns fall in neither and contribute nothing.
    col0 = (pl.program_id(0) * n_steps + step) * tile
    col = col0 + jax.lax.broadcasted_iota(jnp.int32, (1, tile), 1)
    pos_m = (col < num_pos).astype(jnp.float32)
    neg_m = jnp.logical_and(col >= num_pos,
                            col < num_pos + num_neg).astype(jnp.float32)

    # Lane-wide partial sums; no cross-lane work in the hot loop.
    acc_q_ref[...] += quad * pos_m
    acc_n_ref[...] += jnp.maximum(1.0 - quad, 0.0) * neg_m

    @pl.when(step == n_steps - 1)
    def _finalize():
        s_q = jnp.sum(acc_q_ref[...])
        s_n = jnp.sum(acc_n_ref[...])
        lane = jax.lax.broadcasted_iota(jnp.int32, (1, 1, 128), 2)
        out_ref[...] = jnp.where(
            lane == 0, s_q, jnp.where(lane == 1, s_n, 0.0)).astype(jnp.float32)


def _uhg_edge_sums(a, b, *, num_pos, num_neg, tile, n_slices, vmem_limit_bytes):
    """a, b: (D, E_pad) f32 endpoints.  E_pad is a multiple of n_slices * tile.

    Returns (sum_pos_region_quad, sum_neg_region_relu) as f32 scalars.
    """
    d, e_pad = a.shape
    n_per_slice = e_pad // (tile * n_slices)

    edge_map = lambda c, i: (0, c * n_per_slice + i)  # noqa: E731

    # On v7x-class parts, CORE_PARALLEL shards the leading axis across the two
    # TensorCores (each core gets private scratch + its own output row); on
    # single-core chips fall back to a plain serial grid.
    if n_slices > 1 and hasattr(pltpu, "CORE_PARALLEL"):
        dim_sem = (pltpu.CORE_PARALLEL, pltpu.ARBITRARY)
    else:
        dim_sem = ("arbitrary", "arbitrary")

    cost = pl.CostEstimate(
        flops=int((6 * d + 20) * e_pad),
        transcendentals=int(e_pad),
        bytes_accessed=int(2 * d * 4 * e_pad + n_slices * 128 * 4),
    )

    kernel = functools.partial(_uhg_edge_kernel,
                               num_pos=num_pos, num_neg=num_neg)

    out = pl.pallas_call(
        kernel,
        out_shape=jax.ShapeDtypeStruct((n_slices, 1, 128), jnp.float32),
        grid_spec=pltpu.PrefetchScalarGridSpec(
            num_scalar_prefetch=0,
            grid=(n_slices, n_per_slice),
            in_specs=[
                pl.BlockSpec((d, tile), edge_map),
                pl.BlockSpec((d, tile), edge_map),
            ],
            out_specs=pl.BlockSpec((1, 1, 128), lambda c, i: (c, 0, 0)),
            scratch_shapes=[pltpu.VMEM((1, tile), jnp.float32)] * 2,
        ),
        compiler_params=pltpu.CompilerParams(
            dimension_semantics=dim_sem,
            vmem_limit_bytes=vmem_limit_bytes),
        cost_estimate=cost,
    )(a, b)

    sums = jnp.sum(out[:, 0, :], axis=0)          # combine core slices (or 1 row)
    return sums[0], sums[1]


@functools.partial(jax.jit, static_argnames=("batch_size", "max_edge_tile"))
def uhg_loss(z, edge_index, neg_edge_index, batch_size,
             spread_weight=0.001, quad_weight=0.1,
             max_edge_tile=_MAX_EDGE_TILE):
    """JAX/Pallas equivalent of UHGLoss.forward(z, edge_index, batch_size).

    neg_edge_index plays the role of torch.randint(0, batch_size, (2, batch_size)).
    """
    z = z.astype(jnp.float32)
    n, d = z.shape
    num_pos = edge_index.shape[1]
    num_neg = neg_edge_index.shape[1]
    e_total = num_pos + num_neg

    n_slices = 2 if _tensorcores_per_chip() > 1 else 1

    # --- static tile selection (accounts for double-buffered inputs and the
    #     8-sublane-padded (1, tile) accumulators) ---
    d_pad = ((d + 7) // 8) * 8
    per_lane_bytes = 2 * 2 * d_pad * 4 + 2 * 8 * 4   # a,b x 2 buffers + 2 acc rows
    tile_vmem = max(128, (_VMEM_BUDGET // per_lane_bytes) // 128 * 128)
    per_slice = -(-e_total // n_slices)
    tile_cover = ((per_slice + 127) // 128) * 128
    tile = max(128, min(max_edge_tile, tile_vmem, tile_cover))
    vmem_limit = int(min(max(per_lane_bytes * tile + (2 << 20), 16 << 20),
                         32 << 20))

    e_pad = -(-e_total // (n_slices * tile)) * (n_slices * tile)
    pad = e_pad - e_total

    src, dst = edge_index[0], edge_index[1]
    pos_valid = (src < batch_size) & (dst < batch_size)
    count_pos = jnp.sum(pos_valid.astype(jnp.float32))

    # Append two orthogonal unit columns e0, e1: uhg_quadrance(e0, e1) == 1
    # exactly (UHG dot == 0), so edges redirected onto (e0, e1) contribute a
    # known constant to the pos-region sum which we subtract below.
    e0 = jnp.zeros((d, 1), jnp.float32).at[0, 0].set(1.0)
    e1 = jnp.zeros((d, 1), jnp.float32).at[min(1, d - 1), 0].set(1.0)
    zt_ext = jnp.concatenate([z.T, e0, e1], axis=1)            # (D, N + 2)

    idx_dtype = src.dtype
    idx_a = jnp.concatenate([
        jnp.where(pos_valid, src, n).astype(idx_dtype),        # invalid -> e0
        neg_edge_index[0].astype(idx_dtype),
        jnp.full((pad,), n, dtype=idx_dtype),                  # pad -> e0
    ])
    idx_b = jnp.concatenate([
        jnp.where(pos_valid, dst, n + 1).astype(idx_dtype),    # invalid -> e1
        neg_edge_index[1].astype(idx_dtype),
        jnp.full((pad,), n + 1, dtype=idx_dtype),              # pad -> e1
    ])

    # One fused gather per endpoint, directly in the padded (D, E_pad) layout.
    a = jnp.take(zt_ext, idx_a, axis=1)
    b = jnp.take(zt_ext, idx_b, axis=1)

    s_q_raw, s_n = _uhg_edge_sums(
        a, b, num_pos=num_pos, num_neg=num_neg, tile=tile,
        n_slices=n_slices, vmem_limit_bytes=vmem_limit)

    # Each invalid positive edge contributed exactly 1.0; remove them.
    sum_pos_quad = s_q_raw - (jnp.float32(num_pos) - count_pos)

    bs = jnp.float32(batch_size)
    safe_count = jnp.maximum(count_pos, 1.0)

    pos_loss = (sum_pos_quad / safe_count) / bs
    neg_loss = (s_n / jnp.float32(max(num_neg, 1))) / bs
    # uhg_spread has the identical formula to uhg_quadrance on the same pairs.
    spread_loss = pos_loss

    quad_loss = quad_weight * (pos_loss + neg_loss)
    spread_term = spread_weight * spread_loss
    total = jnp.log1p(quad_loss) + jnp.log1p(spread_term)

    # PyTorch returns 0.0 if no positive edges survive the mask.
    return jnp.where(count_pos > 0, total, jnp.float32(0.0))


def _reference_loss(z, edge_index, neg_edge_index, batch_size,
                    spread_weight=0.001, quad_weight=0.1):
    """float64 NumPy port of UHGLoss.forward (negatives passed in explicitly)."""
    z = np.asarray(z, dtype=np.float64)
    ei = np.asarray(edge_index)
    neg = np.asarray(neg_edge_index)

    mask = (ei[0] < batch_size) & (ei[1] < batch_size)
    pos = ei[:, mask]
    if pos.shape[1] == 0:
        return 0.0

    def quadrance(x, y):
        dot = (x[:, :-1] * y[:, :-1]).sum(-1) - x[:, -1] * y[:, -1]
        nx = (x[:, :-1] ** 2).sum(-1) - x[:, -1] ** 2
        ny = (y[:, :-1] ** 2).sum(-1) - y[:, -1] ** 2
        denom = np.maximum(np.abs(nx * ny), _EPS)
        return 1.0 - dot ** 2 / denom

    pos_quad = quadrance(z[pos[0]], z[pos[1]])
    neg_quad = quadrance(z[neg[0]], z[neg[1]])
    spread = quadrance(z[pos[0]], z[pos[1]])      # uhg_spread == uhg_quadrance

    pos_loss = pos_quad.mean() / batch_size
    neg_loss = np.maximum(1.0 - neg_quad, 0.0).mean() / batch_size
    spread_loss = spread.mean() / batch_size
    quad_loss = quad_weight * (pos_loss + neg_loss)
    spread_term = spread_weight * spread_loss
    return np.log1p(quad_loss) + np.log1p(spread_term)


if __name__ == "__main__":
    key = jax.random.PRNGKey(0)
    kz, ke, kn, kz2, ke2, kn2 = jax.random.split(key, 6)

    # Small config (single grid step).
    N, D, E, B = 16, 8, 12, 8          # nodes, feature dim, edges, batch_size
    z = jax.random.normal(kz, (N, D), dtype=jnp.float32)
    edge_index = jax.random.randint(ke, (2, E), 0, N)
    # torch.randint(0, batch_size, (2, batch_size)) equivalent; sampled here so
    # the exact same negatives feed both the kernel path and the reference.
    neg_edge_index = jax.random.randint(kn, (2, B), 0, B)

    loss = uhg_loss(z, edge_index, neg_edge_index, B)
    jax.block_until_ready(loss)
    ref = _reference_loss(z, edge_index, neg_edge_index, B)
    np.testing.assert_allclose(float(loss), float(ref), rtol=5e-3, atol=1e-4)

    # Multi-block config: clamp the tile to 128 so the cross-step accumulation
    # and the mid-tile pos/neg region boundary are exercised.
    N2, D2, E2, B2 = 128, 8, 300, 64
    z2 = jax.random.normal(kz2, (N2, D2), dtype=jnp.float32)
    edge_index2 = jax.random.randint(ke2, (2, E2), 0, N2)
    neg_edge_index2 = jax.random.randint(kn2, (2, B2), 0, B2)

    loss2 = uhg_loss(z2, edge_index2, neg_edge_index2, B2, max_edge_tile=128)
    jax.block_until_ready(loss2)
    ref2 = _reference_loss(z2, edge_index2, neg_edge_index2, B2)
    np.testing.assert_allclose(float(loss2), float(ref2), rtol=5e-3, atol=1e-4)

    print("KERNEL_OK")
</pallas_src>

<mosaic_0001>
module attributes {stable_mosaic.version = 11 : i64} {
  func.func @_uhg_edge_kernel(%arg0: i32, %arg1: i32, %arg2: memref<8x128xf32, #tpu.memory_space<vmem>>, %arg3: memref<8x128xf32, #tpu.memory_space<vmem>>, %arg4: memref<1x1x128xf32, #tpu.memory_space<vmem>>, %arg5: memref<1x128xf32, #tpu.memory_space<vmem>>, %arg6: memref<1x128xf32, #tpu.memory_space<vmem>>) attributes {dimension_semantics = [#tpu.dimension_semantics<arbitrary>, #tpu.dimension_semantics<arbitrary>], iteration_bounds = array<i64: 1, 1>, scalar_prefetch = 0 : i64, scratch_operands = 2 : i64, tpu.core_type = #tpu.core_type<tc>, window_params = [{transform_indices = @transform_0, window_bounds = array<i64: 8, 128>}, {transform_indices = @transform_1, window_bounds = array<i64: 8, 128>}, {transform_indices = @transform_2, window_bounds = array<i64: 1, 1, 128>}]} {
    %c0_i32 = arith.constant 0 : i32
    %0 = arith.cmpi eq, %arg1, %c0_i32 : i32
    %1 = arith.extui %0 : i1 to i32
    %c0_i32_0 = arith.constant 0 : i32
    %2 = arith.cmpi ne, %1, %c0_i32_0 : i32
    scf.if %2 {
      %cst_24 = arith.constant 0.000000e+00 : f32
      %69 = vector.broadcast %cst_24 : f32 to vector<1x128xf32>
      %c0_25 = arith.constant 0 : index
      %c0_26 = arith.constant 0 : index
      %70 = vector.load %arg5[%c0_25, %c0_26] : memref<1x128xf32, #tpu.memory_space<vmem>>, vector<1x128xf32>
      tpu.vector_store %arg5[%c0_25, %c0_26], %69 {strides = array<i32>} : memref<1x128xf32, #tpu.memory_space<vmem>>, vector<1x128xf32>,
      %cst_27 = arith.constant 0.000000e+00 : f32
      %71 = vector.broadcast %cst_27 : f32 to vector<1x128xf32>
      %c0_28 = arith.constant 0 : index
      %c0_29 = arith.constant 0 : index
      %72 = vector.load %arg6[%c0_28, %c0_29] : memref<1x128xf32, #tpu.memory_space<vmem>>, vector<1x128xf32>
      tpu.vector_store %arg6[%c0_28, %c0_29], %71 {strides = array<i32>} : memref<1x128xf32, #tpu.memory_space<vmem>>, vector<1x128xf32>,
    } else {
    }
    %c0 = arith.constant 0 : index
    %c0_1 = arith.constant 0 : index
    %3 = vector.load %arg2[%c0, %c0_1] : memref<8x128xf32, #tpu.memory_space<vmem>>, vector<8x128xf32>
    %c0_2 = arith.constant 0 : index
    %c0_3 = arith.constant 0 : index
    %4 = vector.load %arg3[%c0_2, %c0_3] : memref<8x128xf32, #tpu.memory_space<vmem>>, vector<8x128xf32>
    %5 = vector.extract_strided_slice %3 {offsets = [7, 0], sizes = [1, 128], strides = [1, 1]} : vector<8x128xf32> to vector<1x128xf32>
    %6 = vector.extract_strided_slice %4 {offsets = [7, 0], sizes = [1, 128], strides = [1, 1]} : vector<8x128xf32> to vector<1x128xf32>
    %7 = arith.mulf %3, %4 : vector<8x128xf32>
    %cst = arith.constant dense<0.000000e+00> : vector<128xf32>
    %8 = vector.multi_reduction <add>, %7, %cst [0] : vector<8x128xf32> to vector<128xf32>
    %9 = vector.shape_cast %8 : vector<128xf32> to vector<1x128xf32>
    %cst_4 = arith.constant 2.000000e+00 : f32
    %10 = vector.broadcast %cst_4 : f32 to vector<1x128xf32>
    %11 = arith.mulf %10, %5 : vector<1x128xf32>
    %12 = arith.mulf %11, %6 : vector<1x128xf32>
    %13 = arith.subf %9, %12 : vector<1x128xf32>
    %14 = arith.mulf %3, %3 : vector<8x128xf32>
    %cst_5 = arith.constant dense<0.000000e+00> : vector<128xf32>
    %15 = vector.multi_reduction <add>, %14, %cst_5 [0] : vector<8x128xf32> to vector<128xf32>
    %16 = vector.shape_cast %15 : vector<128xf32> to vector<1x128xf32>
    %cst_6 = arith.constant 2.000000e+00 : f32
    %17 = vector.broadcast %cst_6 : f32 to vector<1x128xf32>
    %18 = arith.mulf %17, %5 : vector<1x128xf32>
    %19 = arith.mulf %18, %5 : vector<1x128xf32>
    %20 = arith.subf %16, %19 : vector<1x128xf32>
    %21 = arith.mulf %4, %4 : vector<8x128xf32>
    %cst_7 = arith.constant dense<0.000000e+00> : vector<128xf32>
    %22 = vector.multi_reduction <add>, %21, %cst_7 [0] : vector<8x128xf32> to vector<128xf32>
    %23 = vector.shape_cast %22 : vector<128xf32> to vector<1x128xf32>
    %cst_8 = arith.constant 2.000000e+00 : f32
    %24 = vector.broadcast %cst_8 : f32 to vector<1x128xf32>
    %25 = arith.mulf %24, %6 : vector<1x128xf32>
    %26 = arith.mulf %25, %6 : vector<1x128xf32>
    %27 = arith.subf %23, %26 : vector<1x128xf32>
    %28 = arith.mulf %20, %27 : vector<1x128xf32>
    %29 = math.absf %28 : vector<1x128xf32>
    %cst_9 = arith.constant 9.99999971E-10 : f32
    %30 = vector.broadcast %cst_9 : f32 to vector<1x128xf32>
    %31 = arith.maximumf %29, %30 : vector<1x128xf32>
    %32 = arith.mulf %13, %13 : vector<1x128xf32>
    %33 = tpu.reciprocal %31 {approx = true} : vector<1x128xf32> -> vector<1x128xf32>
    %34 = arith.mulf %32, %33 : vector<1x128xf32>
    %cst_10 = arith.constant 1.000000e+00 : f32
    %35 = vector.broadcast %cst_10 : f32 to vector<1x128xf32>
    %36 = arith.subf %35, %34 : vector<1x128xf32>
    %c1_i32 = arith.constant 1 : i32
    %37 = arith.muli %arg0, %c1_i32 : i32
    %38 = arith.addi %37, %arg1 : i32
    %c128_i32 = arith.constant 128 : i32
    %39 = arith.muli %38, %c128_i32 : i32
    %40 = tpu.iota {dimensions = array<i32: 1>} : vector<1x128xi32>
    %41 = vector.broadcast %39 : i32 to vector<1x128xi32>
    %42 = arith.addi %41, %40 : vector<1x128xi32>
    %c12_i32 = arith.constant 12 : i32
    %43 = vector.broadcast %c12_i32 : i32 to vector<1x128xi32>
    %44 = arith.cmpi slt, %42, %43 : vector<1x128xi32>
    %45 = arith.extui %44 : vector<1x128xi1> to vector<1x128xi32>
    %46 = arith.sitofp %45 : vector<1x128xi32> to vector<1x128xf32>
    %c12_i32_11 = arith.constant 12 : i32
    %47 = vector.broadcast %c12_i32_11 : i32 to vector<1x128xi32>
    %48 = arith.cmpi sge, %42, %47 : vector<1x128xi32>
    %c20_i32 = arith.constant 20 : i32
    %49 = vector.broadcast %c20_i32 : i32 to vector<1x128xi32>
    %50 = arith.cmpi slt, %42, %49 : vector<1x128xi32>
    %51 = arith.andi %48, %50 : vector<1x128xi1>
    %52 = arith.extui %51 : vector<1x128xi1> to vector<1x128xi32>
    %53 = arith.sitofp %52 : vector<1x128xi32> to vector<1x128xf32>
    %c0_12 = arith.constant 0 : index
    %c0_13 = arith.constant 0 : index
    %54 = vector.load %arg5[%c0_12, %c0_13] : memref<1x128xf32, #tpu.memory_space<vmem>>, vector<1x128xf32>
    %55 = arith.mulf %36, %46 : vector<1x128xf32>
    %56 = arith.addf %54, %55 : vector<1x128xf32>
    %c0_14 = arith.constant 0 : index
    %c0_15 = arith.constant 0 : index
    %57 = vector.load %arg5[%c0_14, %c0_15] : memref<1x128xf32, #tpu.memory_space<vmem>>, vector<1x128xf32>
    tpu.vector_store %arg5[%c0_14, %c0_15], %56 {strides = array<i32>} : memref<1x128xf32, #tpu.memory_space<vmem>>, vector<1x128xf32>,
    %c0_16 = arith.constant 0 : index
    %c0_17 = arith.constant 0 : index
    %58 = vector.load %arg6[%c0_16, %c0_17] : memref<1x128xf32, #tpu.memory_space<vmem>>, vector<1x128xf32>
    %cst_18 = arith.constant 1.000000e+00 : f32
    %59 = vector.broadcast %cst_18 : f32 to vector<1x128xf32>
    %60 = arith.subf %59, %36 : vector<1x128xf32>
    %cst_19 = arith.constant 0.000000e+00 : f32
    %61 = vector.broadcast %cst_19 : f32 to vector<1x128xf32>
    %62 = arith.maximumf %60, %61 : vector<1x128xf32>
    %63 = arith.mulf %62, %53 : vector<1x128xf32>
    %64 = arith.addf %58, %63 : vector<1x128xf32>
    %c0_20 = arith.constant 0 : index
    %c0_21 = arith.constant 0 : index
    %65 = vector.load %arg6[%c0_20, %c0_21] : memref<1x128xf32, #tpu.memory_space<vmem>>, vector<1x128xf32>
    tpu.vector_store %arg6[%c0_20, %c0_21], %64 {strides = array<i32>} : memref<1x128xf32, #tpu.memory_space<vmem>>, vector<1x128xf32>,
    %c0_i32_22 = arith.constant 0 : i32
    %66 = arith.cmpi eq, %arg1, %c0_i32_22 : i32
    %67 = arith.extui %66 : i1 to i32
    %c0_i32_23 = arith.constant 0 : i32
    %68 = arith.cmpi ne, %67, %c0_i32_23 : i32
    scf.if %68 {
      %c0_24 = arith.constant 0 : index
      %c0_25 = arith.constant 0 : index
      %69 = vector.load %arg5[%c0_24, %c0_25] : memref<1x128xf32, #tpu.memory_space<vmem>>, vector<1x128xf32>
      %70 = vector.shape_cast %69 : vector<1x128xf32> to vector<1x1x128xf32>
      %cst_26 = arith.constant dense<0.000000e+00> : vector<1xf32>
      %71 = vector.multi_reduction <add>, %70, %cst_26 [1, 2] : vector<1x1x128xf32> to vector<1xf32>
      %72 = vector.shape_cast %71 : vector<1xf32> to vector<1x1x1xf32>
      %73 = vector.extract %72[0, 0, 0] : f32 from vector<1x1x1xf32>
      %c0_27 = arith.constant 0 : index
      %c0_28 = arith.constant 0 : index
      %74 = vector.load %arg6[%c0_27, %c0_28] : memref<1x128xf32, #tpu.memory_space<vmem>>, vector<1x128xf32>
      %75 = vector.shape_cast %74 : vector<1x128xf32> to vector<1x1x128xf32>
      %cst_29 = arith.constant dense<0.000000e+00> : vector<1xf32>
      %76 = vector.multi_reduction <add>, %75, %cst_29 [1, 2] : vector<1x1x128xf32> to vector<1xf32>
      %77 = vector.shape_cast %76 : vector<1xf32> to vector<1x1x1xf32>
      %78 = vector.extract %77[0, 0, 0] : f32 from vector<1x1x1xf32>
      %79 = tpu.iota {dimensions = array<i32: 2>} : vector<1x1x128xi32>
      %c0_i32_30 = arith.constant 0 : i32
      %80 = vector.broadcast %c0_i32_30 : i32 to vector<1x1x128xi32>
      %81 = arith.cmpi eq, %79, %80 : vector<1x1x128xi32>
      %c1_i32_31 = arith.constant 1 : i32
      %82 = vector.broadcast %c1_i32_31 : i32 to vector<1x1x128xi32>
      %83 = arith.cmpi eq, %79, %82 : vector<1x1x128xi32>
      %cst_32 = arith.constant 0.000000e+00 : f32
      %84 = vector.broadcast %78 : f32 to vector<1x1x128xf32>
      %85 = vector.broadcast %cst_32 : f32 to vector<1x1x128xf32>
      %86 = arith.select %83, %84, %85 : vector<1x1x128xi1>, vector<1x1x128xf32>
      %87 = vector.broadcast %73 : f32 to vector<1x1x128xf32>
      %88 = arith.select %81, %87, %86 : vector<1x1x128xi1>, vector<1x1x128xf32>
      %c0_33 = arith.constant 0 : index
      %c0_34 = arith.constant 0 : index
      %c0_35 = arith.constant 0 : index
      %89 = vector.load %arg4[%c0_33, %c0_34, %c0_35] : memref<1x1x128xf32, #tpu.memory_space<vmem>>, vector<1x1x128xf32>
      tpu.vector_store %arg4[%c0_33, %c0_34, %c0_35], %88 {strides = array<i32>} : memref<1x1x128xf32, #tpu.memory_space<vmem>>, vector<1x1x128xf32>,
    } else {
    }
    return
  }
  func.func @transform_0(%arg0: i32, %arg1: i32) -> (i32, i32) {
    %c1_i32 = arith.constant 1 : i32
    %0 = arith.muli %arg0, %c1_i32 : i32
    %1 = arith.addi %0, %arg1 : i32
    %c0_i32 = arith.constant 0 : i32
    %c0_i32_0 = arith.constant 0 : i32
    return %c0_i32, %1 : i32, i32
  }
  func.func @transform_1(%arg0: i32, %arg1: i32) -> (i32, i32) {
    %c1_i32 = arith.constant 1 : i32
    %0 = arith.muli %arg0, %c1_i32 : i32
    %1 = arith.addi %0, %arg1 : i32
    %c0_i32 = arith.constant 0 : i32
    %c0_i32_0 = arith.constant 0 : i32
    return %c0_i32, %1 : i32, i32
  }
  func.func @transform_2(%arg0: i32, %arg1: i32) -> (i32, i32, i32) {
    %c0_i32 = arith.constant 0 : i32
    %c0_i32_0 = arith.constant 0 : i32
    %c0_i32_1 = arith.constant 0 : i32
    return %arg0, %c0_i32, %c0_i32_0 : i32, i32, i32
  }
}

</mosaic_0001>

<bundles_post_ra>
// kernel: uhg_loss.1
= control target key start
LH: loop header
LB: loop body
LE: loop exit
PB: predicated region body
PF: predicated region fallthrough
CT: control target
= control target key end

     0   :  { %v210_v0 = vmov 0.0   ;;  %v91_v34 = vlaneseq  ;;  %v211_v38 = vmov 1966171168   ;;  %vm155_vm4 = vcmask 1040384   ;;  %s243_s0 = inlined_call_operand.vmem [shape: f32[8,128], index: 0, kind: input, shape index: {}]   ;;  %s244_s1 = inlined_call_operand.vmem [shape: f32[8,128], index: 1, kind: input, shape index: {}]   ;;  %s245_s2 = inlined_call_operand.vmem [shape: f32[1,1,128], index: 2, kind: output, shape index: {}]  }
   0x1   :  { %49 = vst [vmem:[#allocation2] sm:$0x1] %v210_v0  ;;  %v51_v1 = vld [vmem:[%s243_s0] sm:$0xff]  ;;  %50 = vst [vmem:[#allocation3] sm:$0x1] %v210_v0  ;;  %v108_v39 = vunpack.c.l.s4 %v211_v38 }
   0x2   :  { %v52_v2 = vld [vmem:[%s244_s1] sm:$0xff]  ;;  %v63_v4 = vmul.f32 %v51_v1, %v51_v1  ;;  %v60_v12 = vmul.f32 2.0, %v51_v1  ;;  %v233_v36 = vand.u32 127, %v91_v34  ;;  %v111_v43 = vshrl.u32 %v91_v34, 7 }
   0x3   :  { %v53_v3 = vmul.f32 %v52_v2, %v51_v1  ;;  %v72_v5 = vmul.f32 %v52_v2, %v52_v2  ;;  %v79_v15 = vmul.f32 2.0, %v52_v2  ;;  %v109_v42 = vunpack.c.0.s8 %v108_v39 }
   0x4   :  { %v64_v7 = vrot.slane %v63_v4, 4  ;;  %v70_v20 = vmul.f32 %v60_v12, %v51_v1  ;;  %v61_v33 = vmul.f32 %v60_v12, %v52_v2  ;;  %vm95_vm0 = vcmp.lt.s32.totalorder %v233_v36, 12 }
   0x5   :  { %v54_v6 = vrot.slane %v53_v3, 4  ;;  %v73_v8 = vrot.slane %v72_v5, 4  ;;  %v80_v22 = vmul.f32 %v79_v15, %v52_v2  ;;  %vm98_vm1 = vcmp.ge.s32.totalorder %v233_v36, 12 }
   0x6   :  { %v65_v9 = vadd.f32 %v64_v7, %v63_v4  ;;  %vm99_vm2 = vcmp.lt.s32.totalorder %v233_v36, 20  ;;  %v200_v44 = vsel %vm95_vm0, 1.0, %v210_v0  ;;  %v112_v47 = vsub.s32 %v109_v42, %v111_v43 }
   0x7   :  { %v74_v10 = vadd.f32 %v73_v8, %v72_v5  ;;  %v55_v11 = vadd.f32 %v54_v6, %v53_v3  ;;  %vm100_vm3 = vmand %vm98_vm1, %vm99_vm2  ;;  %vm178_vm5 = vcmp.eq.s32.totalorder %v233_v36, 1  ;;  %vm177_vm6 = vcmp.eq.s32.totalorder %v233_v36, 0 }
   0x8   :  { %v66_v13 = vrot.slane %v65_v9, 2  ;;  %v201_v49 = vsel %vm100_vm3, 1.0, %v210_v0  ;;  %v103_v58 = vld [vmem:[#allocation2] sm:$0x1]  ;;  %v126_v63 = vld [vmem:[#allocation3] sm:$0x1] }
   0x9   :  { %v75_v14 = vrot.slane %v74_v10, 2  ;;  %v56_v18 = vrot.slane %v55_v11, 2 }
   0xa   :  { %v67_v16 = vadd.f32 %v66_v13, %v65_v9 }
   0xb   :  { %v76_v17 = vadd.f32 %v75_v14, %v74_v10  ;;  %v57_v25 = vadd.f32 %v56_v18, %v55_v11 }
   0xc   :  { %v68_v19 = vrot.slane %v67_v16, 1 }
   0xd   :  { %v77_v21 = vrot.slane %v76_v17, 1  ;;  %v58_v29 = vrot.slane %v57_v25, 1 }
   0xe   :  { %v69_v23 = vadd.f32 %v68_v19, %v67_v16 }
   0xf   :  { %v78_v24 = vadd.f32 %v77_v21, %v76_v17  ;;  %v59_v32 = vadd.f32 %v58_v29, %v57_v25 }
  0x10   :  { %v71_v26 = vsub.f32 %v69_v23, %v70_v20 }
  0x11   :  { %v81_v27 = vsub.f32 %v78_v24, %v80_v22  ;;  %v62_v35 = vsub.f32 %v59_v32, %v61_v33 }
  0x13   :  { %v82_v28 = vmul.f32 %v81_v27, %v71_v26  ;;  %v85_v37 = vmul.f32 %v62_v35, %v62_v35 }
  0x15   :  { %v83_v30 = vand.u32 2147483647, %v82_v28 }
  0x17   :  { %v84_v31 = vmax.f32 %v83_v30, 1e-09 }
  0x19   :  { %208 = vrcp.f32 %v84_v31 }
  0x23   :  { %v209_v40 = vpop.eup %208 }
  0x24   :  { %v87_v41 = vmul.f32 %v209_v40, %v85_v37 }
  0x26   :  { %v88_v45 = vsub.f32 1.0, %v87_v41 }
  0x28   :  { %v104_v46 = vmul.f32 %v200_v44, %v88_v45  ;;  %v127_v48 = vsub.f32 1.0, %v88_v45 }
  0x2a   :  { %v106_v50 = vcombine.high %v104_v46, %v104_v46  ;;  %v128_v51 = vmax.f32 %v127_v48, 0.0 }
  0x2c   :  { %v113_v52 = vrot.slane %v106_v50, %v112_v47  ;;  %v129_v53 = vmul.f32 %v201_v49, %v128_v51 }
  0x2e   :  { %v114_v54 = vcombine.high %v113_v52, %v113_v52  ;;  %v131_v55 = vcombine.high %v129_v53, %v129_v53 }
  0x30   :  { %v121_v56 = vrot.slane %v114_v54, %v112_v47  ;;  %v138_v57 = vrot.slane %v131_v55, %v112_v47 }
  0x32   :  { %v122_v59 = vcombine.high %v121_v56, %v121_v56  ;;  %v139_v60 = vcombine.high %v138_v57, %v138_v57 }
  0x34   :  { %v124_v61 = vadd.f32 %v122_v59, %v103_v58  ;;  %v146_v62 = vrot.slane %v139_v60, %v112_v47 }
  0x36   :  { %125 = vst [vmem:[#allocation2] sm:$0x1] %v124_v61  ;;  %v147_v1 = vcombine.high %v146_v62, %v146_v62 }
  0x38   :  { %v149_v2 = vadd.f32 %v147_v1, %v126_v63 }
  0x3a   :  { %150 = vst [vmem:[#allocation3] sm:$0x1] %v149_v2 }
  0x3d   :  { %v154_v0 = vld [vmem:[#allocation2] sm:$0x1] }
  0x3e   :  { %v156_v3 = vsel %vm155_vm4, %v154_v0, 0.0 }
  0x3f   :  { %157 = vadd.xlane.f32.xlu0 %v156_v3 }
  0x41   :  { %v166_v4 = vld [vmem:[#allocation3] sm:$0x1] }
  0x42   :  { %v167_v5 = vsel %vm155_vm4, %v166_v4, 0.0 }
  0x43   :  { %168 = vadd.xlane.f32.xlu0 %v167_v5 }
  0xcc   :  { %v158_v6 = vpop.xlane.xlu0 %157 }
  0xcd   :  { %v159_v7 = vrot.slane %v158_v6, 4 }
  0xcf   :  { %v160_v8 = vadd.f32 %v159_v7, %v158_v6 }
  0xd0   :  { %v169_v9 = vpop.xlane.xlu0 %168 }
  0xd1   :  { %v161_v10 = vrot.slane %v160_v8, 2  ;;  %v170_v11 = vrot.slane %v169_v9, 4 }
  0xd3   :  { %v171_v12 = vadd.f32 %v170_v11, %v169_v9  ;;  %v162_v13 = vadd.f32 %v161_v10, %v160_v8 }
  0xd5   :  { %v172_v14 = vrot.slane %v171_v12, 2  ;;  %v163_v15 = vrot.slane %v162_v13, 1 }
  0xd7   :  { %v173_v16 = vadd.f32 %v172_v14, %v171_v12  ;;  %v164_v17 = vadd.f32 %v163_v15, %v162_v13 }
  0xd9   :  { %202 = vpush %v164_v17  ;;  %v174_v18 = vrot.slane %v173_v16, 1 }
  0xdb   :  { %v175_v19 = vadd.f32 %v174_v18, %v173_v16 }
  0xdd   :  { %204 = vpush %v175_v19 }
 0x10a   :  { %s203_s0 = spop %202 }
 0x10b   :  { %v181_v21 = vstv %s203_s0 }
 0x10e   :  { %s205_s1 = spop %204 }
 0x10f   :  { %v179_v20 = vstv %s205_s1 }
 0x110   :  { %v180_v22 = vsel %vm178_vm5, %v179_v20, 0.0 }
 0x111   :  { %v182_v23 = vsel %vm177_vm6, %v181_v21, %v180_v22 }
 0x112   :  { %183 = vst [vmem:[%s245_s2] sm:$0x1] %v182_v23 }

</bundles_post_ra>
